<compile_context>
chip_gen: v5e
topology: v5e:2x2
jax: 0.10.0
libtpu: 0.0.40
codegen_flags: <defaults>
</compile_context>

<pallas_src>
import math

import jax
import jax.numpy as jnp
from jax.experimental import pallas as pl
from jax.experimental.pallas import tpu as pltpu

_SHIFT = math.log(2.0)

_LANE = 128
# ~4 MiB per block per array; 2 arrays x 2 buffers x 4 MiB = 16 MiB, safely
# under the explicit 32 MiB scoped-VMEM limit on all of v5e / v6e / v7x.
_TARGET_BLOCK_BYTES = 4 * 1024 * 1024
_VMEM_LIMIT_BYTES = 32 * 1024 * 1024
_WIDTH_CANDIDATES = (2048, 1024, 512, 256, 128)


def _shifted_softplus_kernel(x_ref, o_ref):
    xf = x_ref[...].astype(jnp.float32)
    # Numerically stable softplus: max(x, 0) + log1p(exp(-|x|)).
    sp = jnp.maximum(xf, 0.0) + jnp.log1p(jnp.exp(-jnp.abs(xf)))
    o_ref[...] = (sp - _SHIFT).astype(o_ref.dtype)


def _sublane_tile(dtype):
    # Packed sublane tile: f32 -> 8, bf16/f16 -> 16, int8/fp8 -> 32.
    return {4: 8, 2: 16, 1: 32}.get(jnp.dtype(dtype).itemsize, 8)


def _pick_row_tile(rows, w, dtype):
    itemsize = jnp.dtype(dtype).itemsize
    sub = _sublane_tile(dtype)

    # Target ~4 MiB per block per array, rounded to the packed sublane tile.
    target = max(sub, (_TARGET_BLOCK_BYTES // (w * itemsize)) // sub * sub)
    row_tile = min(target, rows)

    # Guarantee >= 2 grid steps whenever rows allow it so v7x's two
    # TensorCores both get a share of the stream ("parallel" grid axis).
    if rows >= 2 * sub:
        half_cap = max(sub, (rows // 2) // sub * sub)
        row_tile = min(row_tile, half_cap)

    # Prefer a row_tile that evenly divides rows (no ragged last block ->
    # every step's load/store is unmasked, no compute on stale VMEM), as long
    # as it doesn't shrink the block by more than 2x.
    if rows % row_tile != 0:
        t = (row_tile // sub) * sub
        lo = max(sub, row_tile // 2)
        while t >= lo:
            if rows % t == 0:
                row_tile = t
                break
            t -= sub

    return row_tile


def _pallas_shifted_softplus_2d(x2d, row_tile):
    rows, w = x2d.shape
    n = rows * w
    itemsize = x2d.dtype.itemsize
    return pl.pallas_call(
        _shifted_softplus_kernel,
        out_shape=jax.ShapeDtypeStruct((rows, w), x2d.dtype),
        grid=(pl.cdiv(rows, row_tile),),
        in_specs=[pl.BlockSpec((row_tile, w), lambda i: (i, 0))],
        out_specs=pl.BlockSpec((row_tile, w), lambda i: (i, 0)),
        compiler_params=pltpu.CompilerParams(
            dimension_semantics=("parallel",),
            vmem_limit_bytes=_VMEM_LIMIT_BYTES),
        cost_estimate=pl.CostEstimate(
            flops=4 * n,
            transcendentals=2 * n,
            bytes_accessed=2 * n * itemsize),
    )(x2d)


@jax.jit
def shifted_softplus(x):
    orig_shape = x.shape
    n = x.size
    if n == 0:
        return x

    # Widest lane-dense last dim that evenly divides the element count:
    # the reshape is then metadata-only (no pad, no post-slice, no extra
    # HBM copy).
    w = next((c for c in _WIDTH_CANDIDATES if n % c == 0), None)

    if w is None:
        # Ragged element count (not a multiple of 128): pad + slice around a
        # pallas_call would add two full extra HBM passes, so let XLA's fused
        # elementwise path handle these shapes instead.
        return (jax.nn.softplus(x) - _SHIFT).astype(x.dtype)

    rows = n // w
    x2d = x.reshape(rows, w)

    row_tile = _pick_row_tile(rows, w, x.dtype)
    out2d = _pallas_shifted_softplus_2d(x2d, row_tile)
    return out2d.reshape(orig_shape)


if __name__ == "__main__":
    key = jax.random.PRNGKey(0)

    # Small NCHW-like input, consistent with typical usage of this activation.
    x = jax.random.normal(key, (2, 4, 16, 16), dtype=jnp.float32) * 3.0
    out = jax.block_until_ready(shifted_softplus(x))
    ref = jax.nn.softplus(x) - _SHIFT
    assert out.shape == x.shape and out.dtype == x.dtype
    assert jnp.max(jnp.abs(out - ref)) < 1e-5

    # Slightly larger 128-divisible input: exercises the >=2-step grid path.
    x1 = jax.random.normal(jax.random.PRNGKey(2), (8, 32, 32, 32),
                           dtype=jnp.float32) * 3.0
    out1 = jax.block_until_ready(shifted_softplus(x1))
    ref1 = jax.nn.softplus(x1) - _SHIFT
    assert out1.shape == x1.shape
    assert jnp.max(jnp.abs(out1 - ref1)) < 1e-5

    # Shape that is not 128-divisible: plain-JAX fallback path.
    x2 = jax.random.normal(jax.random.PRNGKey(1), (3, 5, 7), dtype=jnp.float32)
    out2 = jax.block_until_ready(shifted_softplus(x2))
    ref2 = jax.nn.softplus(x2) - _SHIFT
    assert out2.shape == x2.shape and out2.dtype == x2.dtype
    assert jnp.max(jnp.abs(out2 - ref2)) < 1e-5

    print("KERNEL_OK")
</pallas_src>

<mosaic_0001>
module attributes {stable_mosaic.version = 11 : i64} {
  func.func @_shifted_softplus_kernel(%arg0: i32, %arg1: memref<1x2048xf32, #tpu.memory_space<vmem>>, %arg2: memref<1x2048xf32, #tpu.memory_space<vmem>>) attributes {dimension_semantics = [#tpu.dimension_semantics<parallel>], iteration_bounds = array<i64: 1>, scalar_prefetch = 0 : i64, scratch_operands = 0 : i64, tpu.core_type = #tpu.core_type<tc>, window_params = [{transform_indices = @transform_0, window_bounds = array<i64: 1, 2048>}, {transform_indices = @transform_1, window_bounds = array<i64: 1, 2048>}]} {
    %c0 = arith.constant 0 : index
    %c0_0 = arith.constant 0 : index
    %0 = vector.load %arg1[%c0, %c0_0] : memref<1x2048xf32, #tpu.memory_space<vmem>>, vector<1x2048xf32>
    %cst = arith.constant 0.000000e+00 : f32
    %1 = vector.broadcast %cst : f32 to vector<1x2048xf32>
    %2 = arith.maximumf %0, %1 : vector<1x2048xf32>
    %3 = math.absf %0 : vector<1x2048xf32>
    %cst_1 = arith.constant 0.000000e+00 : f32
    %4 = vector.broadcast %cst_1 : f32 to vector<1x2048xf32>
    %5 = arith.subf %4, %3 : vector<1x2048xf32>
    %6 = math.exp %5 : vector<1x2048xf32>
    %7 = math.log1p %6 : vector<1x2048xf32>
    %8 = arith.addf %2, %7 : vector<1x2048xf32>
    %cst_2 = arith.constant 0.693147182 : f32
    %9 = vector.broadcast %cst_2 : f32 to vector<1x2048xf32>
    %10 = arith.subf %8, %9 : vector<1x2048xf32>
    %c0_3 = arith.constant 0 : index
    %c0_4 = arith.constant 0 : index
    %11 = vector.load %arg2[%c0_3, %c0_4] : memref<1x2048xf32, #tpu.memory_space<vmem>>, vector<1x2048xf32>
    tpu.vector_store %arg2[%c0_3, %c0_4], %10 {strides = array<i32>} : memref<1x2048xf32, #tpu.memory_space<vmem>>, vector<1x2048xf32>,
    return
  }
  func.func @transform_0(%arg0: i32) -> (i32, i32) {
    %c0_i32 = arith.constant 0 : i32
    %c0_i32_0 = arith.constant 0 : i32
    return %arg0, %c0_i32 : i32, i32
  }
  func.func @transform_1(%arg0: i32) -> (i32, i32) {
    %c0_i32 = arith.constant 0 : i32
    %c0_i32_0 = arith.constant 0 : i32
    return %arg0, %c0_i32 : i32, i32
  }
}

</mosaic_0001>

<bundles_post_ra>
// kernel: shifted_softplus.1
= control target key start
LH: loop header
LB: loop body
LE: loop exit
PB: predicated region body
PF: predicated region fallthrough
CT: control target
= control target key end

     0   :  { %s80_s0 = inlined_call_operand.vmem [shape: f32[1,2048], index: 0, kind: input, shape index: {}]   ;;  %s81_s1 = inlined_call_operand.vmem [shape: f32[1,2048], index: 1, kind: output, shape index: {}]  }
   0x1   :  { %v8_v0 = vld [vmem:[%s80_s0] sm:$0xff]  ;;  %v9_v1 = vld [vmem:[%s80_s0 + $0x8] sm:$0xff] }
   0x2   :  { %v12_v2 = vand.u32 2147483647, %v8_v0  ;;  %v13_v3 = vand.u32 2147483647, %v9_v1  ;;  %v10_v20 = vmax.f32 %v8_v0, 0.0  ;;  %v11_v24 = vmax.f32 %v9_v1, 0.0 }
   0x4   :  { %v14_v4 = vsub.f32 0.0, %v12_v2  ;;  %v15_v5 = vsub.f32 0.0, %v13_v3 }
   0x6   :  { %v16_v6 = vmul.f32 1.442695, %v14_v4  ;;  %v18_v7 = vmul.f32 1.442695, %v15_v5 }
   0x8   :  { %50 = vpow2.f32 %v16_v6 }
   0x9   :  { %52 = vpow2.f32 %v18_v7 }
   0xe   :  { %v51_v8 = vpop.eup %50 }
   0xf   :  { %v53_v9 = vpop.eup %52  ;;  %v20_v10 = vadd.f32 1.0, %v51_v8  ;;  %v23_v11 = vmul.f32 -0.5, %v51_v8  ;;  %v26_v15 = vand.u32 2147483647, %v51_v8 }
  0x10   :  { %v29_v12 = vadd.f32 1.0, %v53_v9  ;;  %v32_v13 = vmul.f32 -0.5, %v53_v9  ;;  %v35_v17 = vand.u32 2147483647, %v53_v9 }
  0x11   :  { %54 = vlog2.f32 %v20_v10  ;;  %v24_v14 = vadd.f32 1.0, %v23_v11  ;;  %vm27_vm0 = vcmp.lt.f32.partialorder %v26_v15, 0.0004427343 }
  0x12   :  { %56 = vlog2.f32 %v29_v12  ;;  %v33_v16 = vadd.f32 1.0, %v32_v13  ;;  %vm36_vm1 = vcmp.lt.f32.partialorder %v35_v17, 0.0004427343 }
  0x13   :  { %v25_v18 = vmul.f32 %v51_v8, %v24_v14 }
  0x14   :  { %v34_v21 = vmul.f32 %v53_v9, %v33_v16 }
  0x17   :  { %v55_v19 = vpop.eup %54 }
  0x18   :  { %v57_v22 = vpop.eup %56  ;;  %v22_v23 = vmul.f32 0.6931472, %v55_v19 }
  0x19   :  { %v31_v25 = vmul.f32 0.6931472, %v57_v22 }
  0x1a   :  { %v28_v26 = vsel %vm27_vm0, %v25_v18, %v22_v23 }
  0x1b   :  { %v38_v27 = vadd.f32 %v28_v26, %v10_v20  ;;  %v37_v28 = vsel %vm36_vm1, %v34_v21, %v31_v25 }
  0x1c   :  { %v39_v29 = vadd.f32 %v37_v28, %v11_v24 }
  0x1d   :  { %v48_v30 = vadd.f32 -0.6931472, %v38_v27 }
  0x1e   :  { %v49_v31 = vadd.f32 -0.6931472, %v39_v29 }
  0x1f   :  { %42 = vst [vmem:[%s81_s1] sm:$0xff] %v48_v30 }
  0x20   :  { %43 = vst [vmem:[%s81_s1 + $0x8] sm:$0xff] %v49_v31 }

</bundles_post_ra>
